<compile_context>
chip_gen: v7x
topology: tpu7x:2x2x1
jax: 0.10.0
libtpu: 0.0.40
codegen_flags: <defaults>
</compile_context>

<pallas_src>
import functools

import numpy as np

import jax
import jax.numpy as jnp
from jax.experimental import pallas as pl
from jax.experimental.pallas import tpu as pltpu

F32 = jnp.float32
BF16 = jnp.bfloat16
_VMEM = pl.BlockSpec(memory_space=pltpu.MemorySpace.VMEM)
_HI = jax.lax.Precision.HIGHEST
_FC_PAD = 128  # lane-dense head output width


# ----------------------------- fused Pallas kernel -------------------------

def _fused_mobilenet_kernel(*refs, B, L1, s2_idx, n_blocks, prefetch_ids, roll_np_conv):
    """Whole MobileNetV1 forward in one kernel.

    refs = (x_stem, w_stem, b_stem, fc_w, fc_b, [wd_i, bd_i, wp_i, bp_i] * n_blocks,
            out, wp_buf_0..wp_buf_{P-1}, s2_buf, dma_sems)

    x_stem : (B*L1, 3*Cin) bf16   packed stride-2 stem taps
    w_stem : (3*Cin, 32)   bf16   folded stem conv+BN weight;  b_stem (1,32) f32
    fc_w   : (256, 128)    bf16   lane-padded head weight;     fc_b   (1,128) f32
    per block: wd (3,1,Cin) f32, bd (1,Cin) f32, wp (Cin,Cout) bf16, bp (1,Cout) f32
               (wp of the large late blocks is an HBM ref — memory_space=pl.ANY)
    out    : (B, 128) f32
    """
    n_in = 5 + 4 * n_blocks
    x_ref, ws_ref, bs_ref, fcw_ref, fcb_ref = refs[:5]
    blk_refs = refs[5:n_in]
    out_ref = refs[n_in]
    scratch = refs[n_in + 1:]
    n_pf = len(prefetch_ids)
    wp_bufs = scratch[:n_pf]
    s2_buf = scratch[n_pf]
    dma_sems = scratch[n_pf + 1]

    # ---- start streaming the big late-block pointwise weights HBM -> VMEM right away,
    #      so they land behind the early blocks' compute instead of blocking the prologue.
    pending = {}
    for j, bi in enumerate(prefetch_ids):
        cp = pltpu.make_async_copy(blk_refs[4 * bi + 2], wp_bufs[j], dma_sems.at[j])
        cp.start()
        pending[bi] = (cp, wp_bufs[j])

    rows1, rows2 = B * L1, B * (L1 // 2)

    def roll_prev(v):            # out[r] = v[r-1]  (wrap-around masked out below)
        n = v.shape[0]
        return pltpu.roll(v, 1 if roll_np_conv else n - 1, 0)

    def roll_next(v):            # out[r] = v[r+1]
        n = v.shape[0]
        return pltpu.roll(v, n - 1 if roll_np_conv else 1, 0)

    def edge_masks(rows, L):
        # f32 (rows,1) masks that zero the per-sample sequence boundaries (l==0 / l==L-1)
        r = jax.lax.broadcasted_iota(jnp.int32, (rows, 1), 0)
        l_id = (r & (L - 1)) if (L & (L - 1)) == 0 else (r % L)
        m_prev = jnp.where(l_id != 0, 1.0, 0.0).astype(F32)
        m_next = jnp.where(l_id != (L - 1), 1.0, 0.0).astype(F32)
        return m_prev, m_next

    m_a = edge_masks(rows1, L1)
    m_b = edge_masks(rows2, L1 // 2)

    # ---- stem: Conv1d(k=3, s=2, p=1) + folded BN + ReLU, taps packed into K (one dot).
    h = jnp.dot(x_ref[...], ws_ref[...], preferred_element_type=jnp.float32)
    h = jnp.maximum(h + bs_ref[...], 0.0)                      # (B*L1, 32) f32

    # ---- 13 fused depthwise-separable blocks.
    for i in range(n_blocks):
        wd_ref, bd_ref, wp_ref, bp_ref = blk_refs[4 * i: 4 * i + 4]
        m_prev, m_next = m_a if i <= s2_idx else m_b

        # depthwise k=3 (f32 VPU path): neighbour taps via XLU roll + boundary mask,
        # accumulated tap-by-tap to keep live vregs low in the 512/1024-channel blocks.
        y = h * wd_ref[1] + bd_ref[...]
        y = y + (roll_prev(h) * m_prev) * wd_ref[0]
        y = y + (roll_next(h) * m_next) * wd_ref[2]
        y = jnp.maximum(y, 0.0)

        if i == s2_idx:
            # stride-2 block: keep even sequence positions (sublane-strided read, no matmul)
            s2_buf[...] = y
            y = s2_buf[pl.ds(0, rows2, stride=2), :]

        if i in pending:
            cp, buf = pending[i]
            cp.wait()
            wp = buf[...]
        else:
            wp = wp_ref[...]

        # pointwise 1x1 conv (MXU, bf16 operands, f32 accumulate) + folded BN + ReLU
        z = jnp.dot(y.astype(BF16), wp, preferred_element_type=jnp.float32)
        h = jnp.maximum(z + bp_ref[...], 0.0)

    # ---- head: AvgPool1d(8) + Linear (lane-padded to 128 outputs)
    rows, C = h.shape
    pooled = jnp.mean(h.reshape(B, rows // B, C), axis=1)       # (B, 256)
    out_ref[...] = (jnp.dot(pooled.astype(BF16), fcw_ref[...],
                            preferred_element_type=jnp.float32) + fcb_ref[...])


def fused_forward_call(x_stem, kin, *, B, L1, s2_idx, n_blocks, prefetch_ids,
                       wp_shapes, s2_cin, roll_np_conv):
    kern = functools.partial(
        _fused_mobilenet_kernel, B=B, L1=L1, s2_idx=s2_idx, n_blocks=n_blocks,
        prefetch_ids=prefetch_ids, roll_np_conv=roll_np_conv)

    n_head = 5                                   # x_stem, w_stem, b_stem, fc_w, fc_b
    in_specs = [_VMEM] * (n_head + 4 * n_blocks)
    for bi in prefetch_ids:                      # big wp stay in HBM, DMA'd manually
        in_specs[n_head + 4 * bi + 2] = pl.BlockSpec(memory_space=pl.ANY)

    scratch_shapes = (
        [pltpu.VMEM(wp_shapes[k], BF16) for k in range(len(prefetch_ids))]
        + [pltpu.VMEM((B * L1, s2_cin), F32),
           pltpu.SemaphoreType.DMA((len(prefetch_ids),))])

    return pl.pallas_call(
        kern,
        out_shape=jax.ShapeDtypeStruct((B, _FC_PAD), F32),
        in_specs=in_specs,
        out_specs=_VMEM,
        scratch_shapes=scratch_shapes,
    )(x_stem, *kin)


def _probe_roll_convention():
    """Tiny one-off kernel: does pltpu.roll(x, 1, 0) follow np.roll (out[r]=x[r-1])?"""
    def _k(x_ref, o_ref):
        o_ref[...] = pltpu.roll(x_ref[...], 1, 0)
    x = jnp.broadcast_to(jnp.arange(8, dtype=jnp.float32)[:, None], (8, 128))
    out = pl.pallas_call(_k, out_shape=jax.ShapeDtypeStruct((8, 128), jnp.float32),
                         in_specs=[_VMEM], out_specs=_VMEM)(x)
    return bool(np.asarray(out)[1, 0] == 0.0)


# ----------------------------- glue: taps, BN fold -------------------------

def pack_stem_taps(x_ncl):
    """(B, Cin, W) -> packed stride-2 taps (B*L1, 3*Cin), row = b*L1 + l, col = k*Cin + c."""
    B, Cin, W = x_ncl.shape
    h = jnp.transpose(x_ncl, (0, 2, 1))                       # (B, W, Cin)
    hp = jnp.pad(h, ((0, 0), (1, 1), (0, 0)))
    L1 = W // 2
    taps = [hp[:, k:k + 2 * (L1 - 1) + 1:2, :] for k in range(3)]
    xt = jnp.concatenate(taps, axis=-1)                       # (B, L1, 3*Cin)
    return xt.reshape(B * L1, 3 * Cin)


def make_taps(x_nlc, stride):
    """Reference-only: (B, L, C) -> (3, B, L_out, C) taps of Conv1d(k=3, p=1, stride)."""
    B, L, C = x_nlc.shape
    xp = jnp.pad(x_nlc, ((0, 0), (1, 1), (0, 0)))
    L_out = (L + 2 - 3) // stride + 1
    taps = [xp[:, k:k + stride * (L_out - 1) + 1:stride, :] for k in range(3)]
    return jnp.stack(taps, axis=0)


def bn_fold(gamma, beta, mean, var, eps=1e-5):
    scale = gamma / jnp.sqrt(var + eps)
    shift = beta - mean * scale
    return scale, shift


class KeyGen:
    def __init__(self, seed):
        self.key = jax.random.PRNGKey(seed)

    def __call__(self):
        self.key, sub = jax.random.split(self.key)
        return sub


def _init_bn(kg, c):
    gamma = 1.0 + 0.1 * jax.random.normal(kg(), (c,), F32)
    beta = 0.1 * jax.random.normal(kg(), (c,), F32)
    mean = 0.1 * jax.random.normal(kg(), (c,), F32)
    var = 1.0 + 0.1 * jax.random.uniform(kg(), (c,), F32)
    return gamma, beta, mean, var


def init_params(input_planes, num_classes, seed=42):
    kg = KeyGen(seed)
    params = {}

    # conv1: Conv1d(input_planes, 32, k=3, s=2, p=1) + BN + ReLU  (BN folded)
    cout = 32
    w = jax.random.normal(kg(), (cout, input_planes, 3), F32) * (2.0 / (3 * input_planes)) ** 0.5
    b = 0.01 * jax.random.normal(kg(), (cout,), F32)
    sc, sh = bn_fold(*_init_bn(kg, cout))
    params["conv1_w"] = jnp.transpose(w, (2, 1, 0)) * sc[None, None, :]   # (3, Cin, Cout)
    params["conv1_b"] = (b * sc + sh).reshape(1, cout)

    # depthwise-separable blocks: layer0, layer1(x2), layer2(x2), layer3(x6), layer4(s2), layer5
    cfg = ([(32, 64, 1),
            (64, 128, 1), (128, 128, 1),
            (128, 256, 1), (256, 256, 1),
            (256, 512, 1)]
           + [(512, 512, 1)] * 5
           + [(512, 1024, 2), (1024, 256, 1)])
    blocks = []
    for cin, cout, stride in cfg:
        wd = jax.random.normal(kg(), (cin, 1, 3), F32) * (2.0 / 3.0) ** 0.5
        bd = 0.01 * jax.random.normal(kg(), (cin,), F32)
        sc, sh = bn_fold(*_init_bn(kg, cin))
        wd_eff = (jnp.transpose(wd[:, 0, :], (1, 0)) * sc[None, :]).reshape(3, 1, cin)
        bd_eff = (bd * sc + sh).reshape(1, cin)
        wp = jax.random.normal(kg(), (cout, cin, 1), F32) * (2.0 / cin) ** 0.5
        bp = 0.01 * jax.random.normal(kg(), (cout,), F32)
        sc, sh = bn_fold(*_init_bn(kg, cout))
        wp_eff = jnp.transpose(wp[:, :, 0], (1, 0)) * sc[None, :]          # (Cin, Cout)
        bp_eff = (bp * sc + sh).reshape(1, cout)
        blocks.append(dict(stride=stride, wd=wd_eff, bd=bd_eff, wp=wp_eff, bp=bp_eff))
    params["blocks"] = blocks

    wf = jax.random.normal(kg(), (num_classes, 256), F32) * (1.0 / 256.0) ** 0.5
    bf = 0.01 * jax.random.normal(kg(), (num_classes,), F32)
    params["fc_w"] = jnp.transpose(wf, (1, 0))                             # (256, NC)
    params["fc_b"] = bf.reshape(1, num_classes)
    return params


def build_kernel_inputs(params, *, batch_size, window, num_classes, roll_np_conv):
    """Pre-layout / pre-cast all weights for the fused kernel + static metadata."""
    B = batch_size
    L1 = window // 2
    blocks = params["blocks"]
    n_blocks = len(blocks)
    s2_idx = next(i for i, blk in enumerate(blocks) if blk["stride"] == 2)
    s2_cin = blocks[s2_idx]["wp"].shape[0]

    # blocks whose pointwise weight is big enough to stream behind compute (>=256 KB bf16)
    prefetch_ids = tuple(i for i, blk in enumerate(blocks) if blk["wp"].size >= 128 * 1024)
    wp_shapes = tuple(tuple(blocks[i]["wp"].shape) for i in prefetch_ids)

    w_stem = params["conv1_w"].reshape(-1, params["conv1_w"].shape[-1]).astype(BF16)  # (3*Cin, 32)
    b_stem = params["conv1_b"]
    fc_w = jnp.zeros((params["fc_w"].shape[0], _FC_PAD), F32)
    fc_w = fc_w.at[:, :num_classes].set(params["fc_w"]).astype(BF16)
    fc_b = jnp.zeros((1, _FC_PAD), F32).at[:, :num_classes].set(params["fc_b"])

    kin = [w_stem, b_stem, fc_w, fc_b]
    for blk in blocks:
        kin += [blk["wd"], blk["bd"], blk["wp"].astype(BF16), blk["bp"]]

    meta = dict(L1=L1, s2_idx=s2_idx, n_blocks=n_blocks, prefetch_ids=prefetch_ids,
                wp_shapes=wp_shapes, s2_cin=s2_cin, roll_np_conv=roll_np_conv)
    return tuple(kin), meta


# ----------------------------- forward pass --------------------------------

def mobilenet_v1_forward(x, kin, *, batch_size, input_planes, window, num_classes, meta):
    # mirrors x.view(batch_size, input_planes, window); head requires final length == 8
    assert window // 4 == 8, "AvgPool1d(8)+Linear(256) require window == 32"
    x_ncl = x.reshape(batch_size, input_planes, window).astype(F32)
    x_stem = pack_stem_taps(x_ncl).astype(BF16)
    out_pad = fused_forward_call(x_stem, kin, B=batch_size, **meta)
    return out_pad[:, :num_classes]


def reference_forward(x, params, batch_size, input_planes, window):
    """Pure-jnp f32 reference with identical (folded) parameters, for validation."""
    h = x.reshape(batch_size, input_planes, window)
    h = jnp.transpose(h, (0, 2, 1)).astype(F32)
    xt = make_taps(h, stride=2)
    acc = sum(jnp.einsum("blc,cd->bld", xt[k], params["conv1_w"][k], precision=_HI)
              for k in range(3))
    h = jnp.maximum(acc + params["conv1_b"], 0.0)
    for blk in params["blocks"]:
        xt = make_taps(h, blk["stride"])
        y = (xt[0] * blk["wd"][0] + xt[1] * blk["wd"][1] + xt[2] * blk["wd"][2]
             + blk["bd"])
        y = jnp.maximum(y, 0.0)
        z = jnp.einsum("blc,cd->bld", y, blk["wp"], precision=_HI) + blk["bp"]
        h = jnp.maximum(z, 0.0)
    pooled = jnp.mean(h, axis=1)
    return jnp.dot(pooled, params["fc_w"], precision=_HI) + params["fc_b"]


# ----------------------------- main -----------------------------------------

if __name__ == "__main__":
    batch_size, input_planes, window, num_classes = 2, 4, 32, 10

    roll_np_conv = _probe_roll_convention()

    params = init_params(input_planes, num_classes, seed=42)
    kin, meta = build_kernel_inputs(params, batch_size=batch_size, window=window,
                                    num_classes=num_classes, roll_np_conv=roll_np_conv)

    x = jax.random.normal(jax.random.PRNGKey(0),
                          (batch_size, input_planes, window), F32)

    fwd = jax.jit(functools.partial(
        mobilenet_v1_forward, batch_size=batch_size, input_planes=input_planes,
        window=window, num_classes=num_classes, meta=meta))
    out = jax.block_until_ready(fwd(x, kin))

    assert out.shape == (batch_size, num_classes)
    assert np.all(np.isfinite(np.asarray(out)))

    ref = reference_forward(x, params, batch_size, input_planes, window)
    # all depthwise taps are now exact f32 (only the pointwise MXU dots use bf16 weights)
    np.testing.assert_allclose(np.asarray(out), np.asarray(ref), rtol=5e-2, atol=5e-2)

    print("KERNEL_OK")
</pallas_src>

<mosaic_0001>
module attributes {stable_mosaic.version = 11 : i64} {
  func.func @_k(%arg0: memref<8x128xf32, #tpu.memory_space<vmem>>, %arg1: memref<8x128xf32, #tpu.memory_space<vmem>>) attributes {dimension_semantics = [], scalar_prefetch = 0 : i64, scratch_operands = 0 : i64, tpu.core_type = #tpu.core_type<tc>} {
    %c0 = arith.constant 0 : index
    %c0_0 = arith.constant 0 : index
    %0 = vector.load %arg0[%c0, %c0_0] : memref<8x128xf32, #tpu.memory_space<vmem>>, vector<8x128xf32>
    %c1_i32 = arith.constant 1 : i32
    %1 = tpu.dynamic_rotate %0 by %c1_i32 dim 0 : vector<8x128xf32>, i32 -> vector<8x128xf32>
    %c0_1 = arith.constant 0 : index
    %c0_2 = arith.constant 0 : index
    %2 = vector.load %arg1[%c0_1, %c0_2] : memref<8x128xf32, #tpu.memory_space<vmem>>, vector<8x128xf32>
    tpu.vector_store %arg1[%c0_1, %c0_2], %1 {strides = array<i32>} : memref<8x128xf32, #tpu.memory_space<vmem>>, vector<8x128xf32>,
    return
  }
}

</mosaic_0001>

<bundles_post_ra>
// kernel: tpu_custom_call.1
= control target key start
LH: loop header
LB: loop body
LE: loop exit
PB: predicated region body
PF: predicated region fallthrough
CT: control target
= control target key end

     0   :  { %6 = vsyncpa [#allocation3], 0  ;;  %s125_s0 = inlined_call_operand.hbm [shape: f32[8,128], index: 0, kind: input, shape index: {}]   ;;  %s126_s1 = inlined_call_operand.hbm [shape: f32[8,128], index: 1, kind: output, shape index: {}]  }
   0x1   :  { %7 = vsyncpa [#allocation4], 0  ;;  %s89_s6 = smov [#allocation2]   ;;  %s41_s10 = scalar_lea.hbm %s125_s0, 128 }
   0x2   :  { %s14_s7 = sshll.u32 %s89_s6, 4  ;;  %p42_p0 = scmp.ne.s32.totalorder %s125_s0, %s41_s10  ;;  %s15_s7 = int_to_ptr.vmem [resolvable:$true] %s14_s7 }
   0x3   :  { %p45_p1 = scmp.lt.u32.totalorder %s41_s10, %s125_s0 }
   0x5   :  { %p47_p2 = pnand %p45_p1, %p42_p0 }
   0x7   :  { %50 = shalt.err (!%p47_p2)
}
   0x8   :  { %s51_s15 = scalar_lea.vmem %s15_s7, 128  ;;  %p56_p4 = scmp.lt.s32.totalorder %s15_s7, %s15_s7 }
   0x9   :  { %p52_p3 = scmp.ne.s32.totalorder %s15_s7, %s51_s15  ;;  %p57_p5 = scmp.lt.s32.totalorder %s51_s15, %s51_s15 }
   0xb   :  { %p58_p6 = por %p57_p5, %p56_p4 }
   0xd   :  { %p59_p7 = pnand %p58_p6, %p52_p3 }
   0xf   :  { %62 = shalt.err (!%p59_p7)
}
  0x10   :  { %17 = dma.hbm_to_vmem [thread:$0]  %s125_s0, 128, %s15_s7, [#allocation3]  }
  0x11   :  { %85 = dma.done.wait [#allocation3], 128  }
  0x12   :  { %86 = vsyncadd [#allocation3], 4294967168  ;;  %s90_s18 = smov [#allocation5]   ;;  %v21_v0 = vld [vmem:[#allocation2] sm:$0xff] }
  0x13   :  { %s30_s19 = sshll.u32 %s90_s18, 4  ;;  %v22_v1 = vrot.slane %v21_v0, 7  ;;  %s31_s19 = int_to_ptr.vmem [resolvable:$true] %s30_s19 }
  0x14   :  { %s63_s20 = scalar_lea.vmem %s31_s19, 128  ;;  %p68_p9 = scmp.lt.s32.totalorder %s31_s19, %s31_s19 }
  0x15   :  { %23 = vst [vmem:[#allocation5] sm:$0xff] %v22_v1  ;;  %p64_p8 = scmp.ne.s32.totalorder %s31_s19, %s63_s20  ;;  %p69_p10 = scmp.lt.s32.totalorder %s63_s20, %s63_s20 }
  0x17   :  { %p70_p11 = por %p69_p10, %p68_p9 }
  0x19   :  { %p71_p12 = pnand %p70_p11, %p64_p8 }
  0x1b   :  { %74 = shalt.err (!%p71_p12)
}
  0x1c   :  { %s75_s23 = scalar_lea.hbm %s126_s1, 128 }
  0x1d   :  { %p76_p13 = scmp.ne.s32.totalorder %s126_s1, %s75_s23  ;;  %p79_p0 = scmp.lt.u32.totalorder %s75_s23, %s126_s1 }
  0x1f   :  { %p81_p1 = pnand %p79_p0, %p76_p13 }
  0x21   :  { %84 = shalt.err (!%p81_p1)
}
  0x22   :  { %33 = dma.vmem_to_hbm [thread:$0]  %s31_s19, 128, %s126_s1, [#allocation4]  }
  0x23   :  { %87 = dma.done.wait [#allocation4], 128  }
  0x24   :  { %88 = vsyncadd [#allocation4], 4294967168 }
  0x25   :  { %37 = vsyncpa [#allocation3], 1 }
  0x26   :  { %38 = vsyncpa [#allocation4], 1 }

</bundles_post_ra>
